<compile_context>
chip_gen: v6e
topology: v6e:2x2x1
jax: 0.10.0
libtpu: 0.0.40
codegen_flags: <defaults>
</compile_context>

<pallas_src>
import jax
import jax.numpy as jnp
from jax import lax
from jax.experimental import pallas as pl


# ----------------------------------------------------------------------------
# Pallas kernel 1: GRU encoder recurrence (time-reversed), single invocation
# ----------------------------------------------------------------------------
def _make_gru_kernel(T, B, H):
    def kernel(xp_ref, wh3_ref, bhn_ref, hs_ref):
        wh3 = wh3_ref[...]          # (H, 3H)   [Whr | Whz | Whn]
        bhn = bhn_ref[...]          # (1, H)

        def step(s, h):
            t = T - 1 - s           # process reversed sequence, write in place
            xp = xp_ref[t]          # (B, 3H)   hoisted x-projection (+ input biases)
            hp = jnp.dot(h, wh3, preferred_element_type=jnp.float32)   # (B, 3H), one fused dot
            r = jax.nn.sigmoid(xp[:, :H] + hp[:, :H])
            z = jax.nn.sigmoid(xp[:, H:2 * H] + hp[:, H:2 * H])
            n = jnp.tanh(xp[:, 2 * H:] + r * (hp[:, 2 * H:] + bhn))
            h_new = (1.0 - z) * n + z * h
            hs_ref[t] = h_new
            return h_new

        lax.fori_loop(0, T, step, jnp.zeros((B, H), jnp.float32), unroll=True)

    return kernel


def gru_encoder(x, enc):
    """x: (T, B, I) in ORIGINAL time order.
    Returns ctx: (T, B, C) == flip(Linear(GRU(flip(x)))) of the reference."""
    T, B, I = x.shape
    H = enc['whr'].shape[0]

    # Hoisted, time-parallel input projection: one (T*B, I) x (I, 3H) matmul.
    wx3 = jnp.concatenate([enc['wxr'], enc['wxz'], enc['wxn']], axis=1)   # (I, 3H)
    bx3 = jnp.concatenate([enc['br'], enc['bz'], enc['bin']], axis=1)     # (1, 3H)
    xproj = jnp.einsum('tbi,ih->tbh', x, wx3) + bx3                        # (T, B, 3H)
    wh3 = jnp.concatenate([enc['whr'], enc['whz'], enc['whn']], axis=1)   # (H, 3H)

    hs = pl.pallas_call(
        _make_gru_kernel(T, B, H),
        out_shape=jax.ShapeDtypeStruct((T, B, H), jnp.float32),
    )(xproj, wh3, enc['bhn'])

    # Hoisted, time-parallel output Linear: one (T*B, H) x (H, C) matmul.
    return jnp.einsum('tbh,hc->tbc', hs, enc['wlin']) + enc['blin']


# ----------------------------------------------------------------------------
# Pallas kernel 2: Euler-Maruyama SDE integration with logqp term, single call
# ----------------------------------------------------------------------------
def _make_sde_kernel(nsteps, B, L, H, dt):
    def kernel(z0_ref, fc_ref, dw_ref,
               w1y_ref, bh1_ref,
               wf2_ref, bf2_ref, wf3_ref, bf3_ref,
               wh2_ref, bh2_ref, wh3_ref, bh3_ref,
               wg1_ref, bg1_ref, wg2_ref, bg2_ref,
               zs_ref, lr_ref):
        w1y = w1y_ref[...]                      # (L, 2H)  [Wf1_y | Wh1]
        bh1 = bh1_ref[...]
        wf2 = wf2_ref[...]; bf2 = bf2_ref[...]
        wf3 = wf3_ref[...]; bf3 = bf3_ref[...]
        wh2 = wh2_ref[...]; bh2 = bh2_ref[...]
        wh3 = wh3_ref[...]; bh3 = bh3_ref[...]
        wg1 = wg1_ref[...]; bg1 = bg1_ref[...]   # block-diagonal diffusion weights
        wg2 = wg2_ref[...]; bg2 = bg2_ref[...]

        def step(n, carry):
            y, lr = carry                        # (B, L), (B, 1)

            # posterior/prior drift first layers fused into one y-dot;
            # the ctx half of f_net layer 1 (+ bf1) is precomputed in fc_ref.
            yh1 = jnp.dot(y, w1y, preferred_element_type=jnp.float32)     # (B, 2H)
            f1 = jax.nn.softplus(yh1[:, :H] + fc_ref[n])
            h1 = jax.nn.softplus(yh1[:, H:] + bh1)
            f2 = jax.nn.softplus(jnp.dot(f1, wf2, preferred_element_type=jnp.float32) + bf2)
            f = jnp.dot(f2, wf3, preferred_element_type=jnp.float32) + bf3         # (B, L)
            h2 = jax.nn.softplus(jnp.dot(h1, wh2, preferred_element_type=jnp.float32) + bh2)
            h = jnp.dot(h2, wh3, preferred_element_type=jnp.float32) + bh3         # (B, L)

            # diagonal diffusion: per-dim 1->Hg->1 MLPs as lane-dense
            # block-diagonal matmuls on the MXU.
            hg = jax.nn.softplus(jnp.dot(y, wg1, preferred_element_type=jnp.float32) + bg1)  # (B, L*Hg)
            g = jax.nn.sigmoid(jnp.dot(hg, wg2, preferred_element_type=jnp.float32) + bg2)   # (B, L)

            # TODO(synk): g can approach 0 and blow up u; matches the reference
            #             formulation (no epsilon added).
            u = (f - h) / g
            lr = lr + 0.5 * jnp.sum(u * u, axis=-1, keepdims=True) * dt

            z_new = y + f * dt + g * dw_ref[n]
            zs_ref[n] = z_new
            return z_new, lr

        _, lr = lax.fori_loop(0, nsteps, step,
                              (z0_ref[...], jnp.zeros((B, 1), jnp.float32)),
                              unroll=True)
        lr_ref[...] = lr

    return kernel


def sde_integrate_logqp(z0, ctx, dw, dt, f_net, h_net, g_nets):
    """Euler SDE solve with logqp. z0:(B,L), ctx:(T,B,C), dw:(T-1,B,L)
    (already sqrt(dt)-scaled), dt: static Python float.
    Returns zs:(T,B,L), log_ratio_sum:(B,)  (already summed over time)."""
    T, B, C = ctx.shape
    L = z0.shape[1]
    H = f_net['w2'].shape[0]
    nsteps = T - 1

    # Split f_net layer 1 into y-part and ctx-part; hoist the ctx-part as a
    # time-parallel precompute. The context index is ctx[min(n+1, T-1)] = ctx[1:]
    # (torchsde's searchsorted(ts, t, right=True) semantics, as in the reference).
    wf1 = f_net['w1']
    wf1_y, wf1_c = wf1[:L], wf1[L:]
    fctx = jnp.einsum('tbc,ch->tbh', ctx[1:], wf1_c) + f_net['b1']        # (nsteps, B, H)

    # Fuse f_net / h_net first-layer y-dots into one weight.
    w1y = jnp.concatenate([wf1_y, h_net['w1']], axis=1)                    # (L, 2H)

    # Block-diagonal lane-dense layout of the per-dim diffusion MLPs.
    Hg = g_nets['w1'].shape[1]
    eyeL = jnp.eye(L, dtype=jnp.float32)
    wg1_blk = (eyeL[:, :, None] * g_nets['w1'][None, :, :]).reshape(L, L * Hg)   # (L, L*Hg)
    bg1_flat = g_nets['b1'].reshape(1, L * Hg)                                    # (1, L*Hg)
    wg2_blk = (eyeL[:, None, :] * g_nets['w2'][:, :, None]).reshape(L * Hg, L)   # (L*Hg, L)

    args = (z0, fctx, dw,
            w1y, h_net['b1'],
            f_net['w2'], f_net['b2'], f_net['w3'], f_net['b3'],
            h_net['w2'], h_net['b2'], h_net['w3'], h_net['b3'],
            wg1_blk, bg1_flat, wg2_blk, g_nets['b2'])

    zs_tail, lr_sum = pl.pallas_call(
        _make_sde_kernel(nsteps, B, L, H, dt),
        out_shape=(jax.ShapeDtypeStruct((nsteps, B, L), jnp.float32),
                   jax.ShapeDtypeStruct((B, 1), jnp.float32)),
    )(*args)

    zs = jnp.concatenate([z0[None], zs_tail], axis=0)
    return zs, lr_sum[:, 0]


# ----------------------------------------------------------------------------
# Parameters (deterministic synthetic init; no checkpoint loading)
# ----------------------------------------------------------------------------
def init_params(key, *, latent, context, hidden, state_dim, player_ids_len, shot_type_len):
    keys = iter(jax.random.split(key, 64))

    def nrm(shape, s=0.1):
        return (s * jax.random.normal(next(keys), shape)).astype(jnp.float32)

    return {
        'shot_embedding': nrm((shot_type_len, 8)),
        'player_embedding': nrm((player_ids_len, 8)),
        'encoder': {
            'wxr': nrm((state_dim, hidden)), 'wxz': nrm((state_dim, hidden)), 'wxn': nrm((state_dim, hidden)),
            'whr': nrm((hidden, hidden)), 'whz': nrm((hidden, hidden)), 'whn': nrm((hidden, hidden)),
            'br': nrm((1, hidden)), 'bz': nrm((1, hidden)), 'bin': nrm((1, hidden)), 'bhn': nrm((1, hidden)),
            'wlin': nrm((hidden, context)), 'blin': nrm((1, context)),
        },
        'qz0_w': nrm((context, 2 * latent)), 'qz0_b': nrm((2 * latent,)),
        'f_net': {'w1': nrm((latent + context, hidden)), 'b1': nrm((1, hidden)),
                  'w2': nrm((hidden, hidden)), 'b2': nrm((1, hidden)),
                  'w3': nrm((hidden, latent)), 'b3': nrm((1, latent))},
        'h_net': {'w1': nrm((latent, hidden)), 'b1': nrm((1, hidden)),
                  'w2': nrm((hidden, hidden)), 'b2': nrm((1, hidden)),
                  'w3': nrm((hidden, latent)), 'b3': nrm((1, latent))},
        'g_nets': {'w1': nrm((latent, hidden)), 'b1': nrm((latent, hidden)),
                   'w2': nrm((latent, hidden)), 'b2': nrm((1, latent))},
        'proj_w': nrm((latent, state_dim)), 'proj_b': nrm((state_dim,)),
        'act_fc_w': nrm((latent, 128)), 'act_fc_b': nrm((128,)),
        'act_land_w': nrm((128, 2)), 'act_shot_w': nrm((128, shot_type_len)), 'act_move_w': nrm((128, 2)),
        'pz0_mean': jnp.zeros((1, latent), jnp.float32),
        'pz0_logstd': jnp.zeros((1, latent), jnp.float32),
    }


# ----------------------------------------------------------------------------
# LatentSDE.forward
# ----------------------------------------------------------------------------
def latent_sde_forward(params, xs_raw, ts, noise_std, key, *, dt=None,
                       latent, state_dim=32, action_dim=5, shot_type_len=12):
    T, B, _ = xs_raw.shape

    # dt must be a static Python float (one Euler step per ts interval).
    # Passing dt explicitly avoids concretizing a traced ts under jit.
    if dt is None:
        dt = float(ts[1] - ts[0])

    # ---- SDE_embed_and_transform (INV.embed_and_transform on state part) ----
    state = xs_raw[:, :, :18]
    action = xs_raw[:, :, 18:]
    shot_types = state[:, :, 12].astype(jnp.int32)
    player_ids = state[:, :, 17].astype(jnp.int32)
    shot_emb = jnp.take(params['shot_embedding'], shot_types, axis=0)       # (T,B,8)
    player_emb = jnp.take(params['player_embedding'], player_ids, axis=0)   # (T,B,8)
    state_t = jnp.concatenate(
        [state[:, :, :12], shot_emb, state[:, :, 13:17], player_emb], axis=-1)   # (T,B,32)
    xs = jnp.concatenate([state_t, action], axis=-1).astype(jnp.float32)         # (T,B,37)

    # ---- Encoder on time-reversed state (reversal folded into the kernel) ----
    ctx = gru_encoder(xs[:, :, :state_dim], params['encoder'])                    # (T,B,C)

    # ---- qz0 and z0 sample ----
    q = ctx[0] @ params['qz0_w'] + params['qz0_b']                                # (B,2L)
    qz0_mean, qz0_logstd = q[:, :latent], q[:, latent:]
    k_z0, k_bm = jax.random.split(key)
    z0 = qz0_mean + jnp.exp(qz0_logstd) * jax.random.normal(k_z0, qz0_mean.shape)

    # ---- sdeint(..., logqp=True, method='euler'), dt == ts spacing ----
    dw = jnp.sqrt(dt) * jax.random.normal(k_bm, (T - 1, B, latent), jnp.float32)
    zs, log_ratio_sum = sde_integrate_logqp(z0, ctx, dw, dt,
                                            params['f_net'], params['h_net'], params['g_nets'])

    # ---- projector ----
    _xs = zs @ params['proj_w'] + params['proj_b']                                # (T,B,32)

    # ---- action_model (MLP) ----
    hid = jax.nn.relu(zs @ params['act_fc_w'] + params['act_fc_b'])               # (T,B,128)
    land = hid @ params['act_land_w']
    shot = hid @ params['act_shot_w']
    move = hid @ params['act_move_w']

    true_actions = xs[:, :, -action_dim:]
    true_land = true_actions[:, :, :2].reshape(-1, 2)
    true_move = true_actions[:, :, 3:].reshape(-1, 2)
    true_shot = true_actions[:, :, 2].astype(jnp.int32).reshape(-1)

    land_loss = jnp.mean((land.reshape(-1, 2) - true_land) ** 2)
    move_loss = jnp.mean((move.reshape(-1, 2) - true_move) ** 2)

    logits = shot.reshape(-1, shot_type_len)
    logp = jax.nn.log_softmax(logits, axis=-1)
    nll = -jnp.take_along_axis(logp, true_shot[:, None], axis=1)[:, 0]
    mask = (true_shot != 0).astype(jnp.float32)                                   # ignore_index=0
    shot_loss = jnp.sum(nll * mask) / jnp.sum(mask)

    # ---- log p(x | z) under Normal(_xs, noise_std) ----
    sigma = jnp.asarray(noise_std, jnp.float32)
    diff = xs[:, :, :state_dim] - _xs
    logprob = -0.5 * (diff / sigma) ** 2 - jnp.log(sigma) - 0.5 * jnp.log(2.0 * jnp.pi)
    log_pxs = logprob.sum(axis=(0, 2)).mean(axis=0)

    # ---- KL(q(z0) || p(z0)) ----
    sq = jnp.exp(qz0_logstd)
    sp = jnp.exp(params['pz0_logstd'])
    kl = (params['pz0_logstd'] - qz0_logstd) \
         + (sq ** 2 + (qz0_mean - params['pz0_mean']) ** 2) / (2.0 * sp ** 2) - 0.5
    logqp0 = kl.sum(axis=1).mean(axis=0)
    logqp_path = log_ratio_sum.mean(axis=0)          # log_ratio already summed over time

    return log_pxs, logqp0 + logqp_path + land_loss + shot_loss + move_loss


# ----------------------------------------------------------------------------
if __name__ == "__main__":
    T, B = 8, 2                       # SEQ_LEN = T
    latent, context, hidden = 16, 16, 32
    player_ids_len, shot_type_len = 35, 12
    state_dim, action_dim = 32, 5     # data_size = 37

    key = jax.random.PRNGKey(0)
    kp, kx, ki1, ki2, ki3, kz = jax.random.split(key, 6)

    params = init_params(kp, latent=latent, context=context, hidden=hidden,
                         state_dim=state_dim, player_ids_len=player_ids_len,
                         shot_type_len=shot_type_len)

    # raw input: (T, B, 23) = 18 raw state cols (col 12 = shot id, col 17 = player id)
    #            + 5 action cols (land xy, shot id, move xy)
    xs_raw = jax.random.normal(kx, (T, B, 23), jnp.float32)
    shot_col = jax.random.randint(ki1, (T, B), 0, shot_type_len).astype(jnp.float32)
    player_col = jax.random.randint(ki2, (T, B), 0, player_ids_len).astype(jnp.float32)
    act_shot_col = jax.random.randint(ki3, (T, B), 0, shot_type_len).at[0, 0].set(3).astype(jnp.float32)
    xs_raw = xs_raw.at[:, :, 12].set(shot_col)
    xs_raw = xs_raw.at[:, :, 17].set(player_col)
    xs_raw = xs_raw.at[:, :, 20].set(act_shot_col)

    dt = 2.0 / T                       # dt = 2 / SEQ_LEN (static Python float)
    ts = jnp.arange(T, dtype=jnp.float32) * dt

    log_pxs, loss = latent_sde_forward(params, xs_raw, ts, noise_std=0.5, key=kz,
                                       dt=dt, latent=latent, state_dim=state_dim,
                                       action_dim=action_dim, shot_type_len=shot_type_len)
    jax.block_until_ready((log_pxs, loss))
    assert jnp.isfinite(log_pxs) and jnp.isfinite(loss)
    print("KERNEL_OK")
</pallas_src>

<mosaic_0001>
module attributes {stable_mosaic.version = 11 : i64} {
  func.func @kernel(%arg0: memref<8x2x96xf32, #tpu.memory_space<vmem>>, %arg1: memref<32x96xf32, #tpu.memory_space<vmem>>, %arg2: memref<1x32xf32, #tpu.memory_space<vmem>>, %arg3: memref<8x2x32xf32, #tpu.memory_space<vmem>>) attributes {dimension_semantics = [], scalar_prefetch = 0 : i64, scratch_operands = 0 : i64, tpu.core_type = #tpu.core_type<tc>} {
    %c0 = arith.constant 0 : index
    %c0_0 = arith.constant 0 : index
    %0 = vector.load %arg1[%c0, %c0_0] : memref<32x96xf32, #tpu.memory_space<vmem>>, vector<32x96xf32>
    %c0_1 = arith.constant 0 : index
    %c0_2 = arith.constant 0 : index
    %1 = vector.load %arg2[%c0_1, %c0_2] : memref<1x32xf32, #tpu.memory_space<vmem>>, vector<1x32xf32>
    %cst = arith.constant 0.000000e+00 : f32
    %2 = vector.broadcast %cst : f32 to vector<2x32xf32>
    %c0_i32 = arith.constant 0 : i32
    %c7_i32 = arith.constant 7 : i32
    %3 = arith.subi %c7_i32, %c0_i32 : i32
    %4 = arith.index_cast %3 : i32 to index
    %c0_3 = arith.constant 0 : index
    %c0_4 = arith.constant 0 : index
    %5 = vector.load %arg0[%4, %c0_3, %c0_4] : memref<8x2x96xf32, #tpu.memory_space<vmem>>, vector<1x2x96xf32>
    %6 = vector.shape_cast %5 : vector<1x2x96xf32> to vector<2x96xf32>
    %cst_5 = arith.constant dense<0.000000e+00> : vector<2x96xf32>
    %7 = tpu.matmul %2, %0, %cst_5 {dimension_numbers = #tpu.dot_dimension_numbers<[1], [0], [0], [1], [0, 0, 1, 1], [], []>} : vector<2x32xf32>, vector<32x96xf32>, vector<2x96xf32> -> vector<2x96xf32>
    %8 = vector.extract_strided_slice %6 {offsets = [0, 0], sizes = [2, 32], strides = [1, 1]} : vector<2x96xf32> to vector<2x32xf32>
    %9 = vector.extract_strided_slice %7 {offsets = [0, 0], sizes = [2, 32], strides = [1, 1]} : vector<2x96xf32> to vector<2x32xf32>
    %10 = arith.addf %8, %9 : vector<2x32xf32>
    %11 = arith.negf %10 : vector<2x32xf32>
    %12 = math.exp %11 : vector<2x32xf32>
    %cst_6 = arith.constant 1.000000e+00 : f32
    %13 = vector.broadcast %cst_6 : f32 to vector<2x32xf32>
    %14 = arith.addf %13, %12 : vector<2x32xf32>
    %15 = arith.divf %13, %14 : vector<2x32xf32>
    %16 = vector.extract_strided_slice %6 {offsets = [0, 32], sizes = [2, 32], strides = [1, 1]} : vector<2x96xf32> to vector<2x32xf32>
    %17 = vector.extract_strided_slice %7 {offsets = [0, 32], sizes = [2, 32], strides = [1, 1]} : vector<2x96xf32> to vector<2x32xf32>
    %18 = arith.addf %16, %17 : vector<2x32xf32>
    %19 = arith.negf %18 : vector<2x32xf32>
    %20 = math.exp %19 : vector<2x32xf32>
    %cst_7 = arith.constant 1.000000e+00 : f32
    %21 = vector.broadcast %cst_7 : f32 to vector<2x32xf32>
    %22 = arith.addf %21, %20 : vector<2x32xf32>
    %23 = arith.divf %21, %22 : vector<2x32xf32>
    %24 = vector.extract_strided_slice %6 {offsets = [0, 64], sizes = [2, 32], strides = [1, 1]} : vector<2x96xf32> to vector<2x32xf32>
    %25 = vector.extract_strided_slice %7 {offsets = [0, 64], sizes = [2, 32], strides = [1, 1]} : vector<2x96xf32> to vector<2x32xf32>
    %26 = vector.broadcast %1 : vector<1x32xf32> to vector<2x32xf32>
    %27 = arith.addf %25, %26 : vector<2x32xf32>
    %28 = arith.mulf %15, %27 : vector<2x32xf32>
    %29 = arith.addf %24, %28 : vector<2x32xf32>
    %30 = math.tanh %29 : vector<2x32xf32>
    %cst_8 = arith.constant 1.000000e+00 : f32
    %31 = vector.broadcast %cst_8 : f32 to vector<2x32xf32>
    %32 = arith.subf %31, %23 : vector<2x32xf32>
    %33 = arith.mulf %32, %30 : vector<2x32xf32>
    %34 = arith.mulf %23, %2 : vector<2x32xf32>
    %35 = arith.addf %33, %34 : vector<2x32xf32>
    %36 = arith.index_cast %3 : i32 to index
    %c0_9 = arith.constant 0 : index
    %c0_10 = arith.constant 0 : index
    %37 = vector.load %arg3[%36, %c0_9, %c0_10] : memref<8x2x32xf32, #tpu.memory_space<vmem>>, vector<1x2x32xf32>
    %38 = vector.shape_cast %37 : vector<1x2x32xf32> to vector<2x32xf32>
    %39 = vector.shape_cast %35 : vector<2x32xf32> to vector<1x2x32xf32>
    tpu.vector_store %arg3[%36, %c0_9, %c0_10], %39 {strides = array<i32>} : memref<8x2x32xf32, #tpu.memory_space<vmem>>, vector<1x2x32xf32>,
    %c1_i32 = arith.constant 1 : i32
    %c7_i32_11 = arith.constant 7 : i32
    %40 = arith.subi %c7_i32_11, %c1_i32 : i32
    %41 = arith.index_cast %40 : i32 to index
    %c0_12 = arith.constant 0 : index
    %c0_13 = arith.constant 0 : index
    %42 = vector.load %arg0[%41, %c0_12, %c0_13] : memref<8x2x96xf32, #tpu.memory_space<vmem>>, vector<1x2x96xf32>
    %43 = vector.shape_cast %42 : vector<1x2x96xf32> to vector<2x96xf32>
    %cst_14 = arith.constant dense<0.000000e+00> : vector<2x96xf32>
    %44 = tpu.matmul %35, %0, %cst_14 {dimension_numbers = #tpu.dot_dimension_numbers<[1], [0], [0], [1], [0, 0, 1, 1], [], []>} : vector<2x32xf32>, vector<32x96xf32>, vector<2x96xf32> -> vector<2x96xf32>
    %45 = vector.extract_strided_slice %43 {offsets = [0, 0], sizes = [2, 32], strides = [1, 1]} : vector<2x96xf32> to vector<2x32xf32>
    %46 = vector.extract_strided_slice %44 {offsets = [0, 0], sizes = [2, 32], strides = [1, 1]} : vector<2x96xf32> to vector<2x32xf32>
    %47 = arith.addf %45, %46 : vector<2x32xf32>
    %48 = arith.negf %47 : vector<2x32xf32>
    %49 = math.exp %48 : vector<2x32xf32>
    %cst_15 = arith.constant 1.000000e+00 : f32
    %50 = vector.broadcast %cst_15 : f32 to vector<2x32xf32>
    %51 = arith.addf %50, %49 : vector<2x32xf32>
    %52 = arith.divf %50, %51 : vector<2x32xf32>
    %53 = vector.extract_strided_slice %43 {offsets = [0, 32], sizes = [2, 32], strides = [1, 1]} : vector<2x96xf32> to vector<2x32xf32>
    %54 = vector.extract_strided_slice %44 {offsets = [0, 32], sizes = [2, 32], strides = [1, 1]} : vector<2x96xf32> to vector<2x32xf32>
    %55 = arith.addf %53, %54 : vector<2x32xf32>
    %56 = arith.negf %55 : vector<2x32xf32>
    %57 = math.exp %56 : vector<2x32xf32>
    %cst_16 = arith.constant 1.000000e+00 : f32
    %58 = vector.broadcast %cst_16 : f32 to vector<2x32xf32>
    %59 = arith.addf %58, %57 : vector<2x32xf32>
    %60 = arith.divf %58, %59 : vector<2x32xf32>
    %61 = vector.extract_strided_slice %43 {offsets = [0, 64], sizes = [2, 32], strides = [1, 1]} : vector<2x96xf32> to vector<2x32xf32>
    %62 = vector.extract_strided_slice %44 {offsets = [0, 64], sizes = [2, 32], strides = [1, 1]} : vector<2x96xf32> to vector<2x32xf32>
    %63 = vector.broadcast %1 : vector<1x32xf32> to vector<2x32xf32>
    %64 = arith.addf %62, %63 : vector<2x32xf32>
    %65 = arith.mulf %52, %64 : vector<2x32xf32>
    %66 = arith.addf %61, %65 : vector<2x32xf32>
    %67 = math.tanh %66 : vector<2x32xf32>
    %cst_17 = arith.constant 1.000000e+00 : f32
    %68 = vector.broadcast %cst_17 : f32 to vector<2x32xf32>
    %69 = arith.subf %68, %60 : vector<2x32xf32>
    %70 = arith.mulf %69, %67 : vector<2x32xf32>
    %71 = arith.mulf %60, %35 : vector<2x32xf32>
    %72 = arith.addf %70, %71 : vector<2x32xf32>
    %73 = arith.index_cast %40 : i32 to index
    %c0_18 = arith.constant 0 : index
    %c0_19 = arith.constant 0 : index
    %74 = vector.load %arg3[%73, %c0_18, %c0_19] : memref<8x2x32xf32, #tpu.memory_space<vmem>>, vector<1x2x32xf32>
    %75 = vector.shape_cast %74 : vector<1x2x32xf32> to vector<2x32xf32>
    %76 = vector.shape_cast %72 : vector<2x32xf32> to vector<1x2x32xf32>
    tpu.vector_store %arg3[%73, %c0_18, %c0_19], %76 {strides = array<i32>} : memref<8x2x32xf32, #tpu.memory_space<vmem>>, vector<1x2x32xf32>,
    %c2_i32 = arith.constant 2 : i32
    %c7_i32_20 = arith.constant 7 : i32
    %77 = arith.subi %c7_i32_20, %c2_i32 : i32
    %78 = arith.index_cast %77 : i32 to index
    %c0_21 = arith.constant 0 : index
    %c0_22 = arith.constant 0 : index
    %79 = vector.load %arg0[%78, %c0_21, %c0_22] : memref<8x2x96xf32, #tpu.memory_space<vmem>>, vector<1x2x96xf32>
    %80 = vector.shape_cast %79 : vector<1x2x96xf32> to vector<2x96xf32>
    %cst_23 = arith.constant dense<0.000000e+00> : vector<2x96xf32>
    %81 = tpu.matmul %72, %0, %cst_23 {dimension_numbers = #tpu.dot_dimension_numbers<[1], [0], [0], [1], [0, 0, 1, 1], [], []>} : vector<2x32xf32>, vector<32x96xf32>, vector<2x96xf32> -> vector<2x96xf32>
    %82 = vector.extract_strided_slice %80 {offsets = [0, 0], sizes = [2, 32], strides = [1, 1]} : vector<2x96xf32> to vector<2x32xf32>
    %83 = vector.extract_strided_slice %81 {offsets = [0, 0], sizes = [2, 32], strides = [1, 1]} : vector<2x96xf32> to vector<2x32xf32>
    %84 = arith.addf %82, %83 : vector<2x32xf32>
    %85 = arith.negf %84 : vector<2x32xf32>
    %86 = math.exp %85 : vector<2x32xf32>
    %cst_24 = arith.constant 1.000000e+00 : f32
    %87 = vector.broadcast %cst_24 : f32 to vector<2x32xf32>
    %88 = arith.addf %87, %86 : vector<2x32xf32>
    %89 = arith.divf %87, %88 : vector<2x32xf32>
    %90 = vector.extract_strided_slice %80 {offsets = [0, 32], sizes = [2, 32], strides = [1, 1]} : vector<2x96xf32> to vector<2x32xf32>
    %91 = vector.extract_strided_slice %81 {offsets = [0, 32], sizes = [2, 32], strides = [1, 1]} : vector<2x96xf32> to vector<2x32xf32>
    %92 = arith.addf %90, %91 : vector<2x32xf32>
    %93 = arith.negf %92 : vector<2x32xf32>
    %94 = math.exp %93 : vector<2x32xf32>
    %cst_25 = arith.constant 1.000000e+00 : f32
    %95 = vector.broadcast %cst_25 : f32 to vector<2x32xf32>
    %96 = arith.addf %95, %94 : vector<2x32xf32>
    %97 = arith.divf %95, %96 : vector<2x32xf32>
    %98 = vector.extract_strided_slice %80 {offsets = [0, 64], sizes = [2, 32], strides = [1, 1]} : vector<2x96xf32> to vector<2x32xf32>
    %99 = vector.extract_strided_slice %81 {offsets = [0, 64], sizes = [2, 32], strides = [1, 1]} : vector<2x96xf32> to vector<2x32xf32>
    %100 = vector.broadcast %1 : vector<1x32xf32> to vector<2x32xf32>
    %101 = arith.addf %99, %100 : vector<2x32xf32>
    %102 = arith.mulf %89, %101 : vector<2x32xf32>
    %103 = arith.addf %98, %102 : vector<2x32xf32>
    %104 = math.tanh %103 : vector<2x32xf32>
    %cst_26 = arith.constant 1.000000e+00 : f32
    %105 = vector.broadcast %cst_26 : f32 to vector<2x32xf32>
    %106 = arith.subf %105, %97 : vector<2x32xf32>
    %107 = arith.mulf %106, %104 : vector<2x32xf32>
    %108 = arith.mulf %97, %72 : vector<2x32xf32>
    %109 = arith.addf %107, %108 : vector<2x32xf32>
    %110 = arith.index_cast %77 : i32 to index
    %c0_27 = arith.constant 0 : index
    %c0_28 = arith.constant 0 : index
    %111 = vector.load %arg3[%110, %c0_27, %c0_28] : memref<8x2x32xf32, #tpu.memory_space<vmem>>, vector<1x2x32xf32>
    %112 = vector.shape_cast %111 : vector<1x2x32xf32> to vector<2x32xf32>
    %113 = vector.shape_cast %109 : vector<2x32xf32> to vector<1x2x32xf32>
    tpu.vector_store %arg3[%110, %c0_27, %c0_28], %113 {strides = array<i32>} : memref<8x2x32xf32, #tpu.memory_space<vmem>>, vector<1x2x32xf32>,
    %c3_i32 = arith.constant 3 : i32
    %c7_i32_29 = arith.constant 7 : i32
    %114 = arith.subi %c7_i32_29, %c3_i32 : i32
    %115 = arith.index_cast %114 : i32 to index
    %c0_30 = arith.constant 0 : index
    %c0_31 = arith.constant 0 : index
    %116 = vector.load %arg0[%115, %c0_30, %c0_31] : memref<8x2x96xf32, #tpu.memory_space<vmem>>, vector<1x2x96xf32>
    %117 = vector.shape_cast %116 : vector<1x2x96xf32> to vector<2x96xf32>
    %cst_32 = arith.constant dense<0.000000e+00> : vector<2x96xf32>
    %118 = tpu.matmul %109, %0, %cst_32 {dimension_numbers = #tpu.dot_dimension_numbers<[1], [0], [0], [1], [0, 0, 1, 1], [], []>} : vector<2x32xf32>, vector<32x96xf32>, vector<2x96xf32> -> vector<2x96xf32>
    %119 = vector.extract_strided_slice %117 {offsets = [0, 0], sizes = [2, 32], strides = [1, 1]} : vector<2x96xf32> to vector<2x32xf32>
    %120 = vector.extract_strided_slice %118 {offsets = [0, 0], sizes = [2, 32], strides = [1, 1]} : vector<2x96xf32> to vector<2x32xf32>
    %121 = arith.addf %119, %120 : vector<2x32xf32>
    %122 = arith.negf %121 : vector<2x32xf32>
    %123 = math.exp %122 : vector<2x32xf32>
    %cst_33 = arith.constant 1.000000e+00 : f32
    %124 = vector.broadcast %cst_33 : f32 to vector<2x32xf32>
    %125 = arith.addf %124, %123 : vector<2x32xf32>
    %126 = arith.divf %124, %125 : vector<2x32xf32>
    %127 = vector.extract_strided_slice %117 {offsets = [0, 32], sizes = [2, 32], strides = [1, 1]} : vector<2x96xf32> to vector<2x32xf32>
    %128 = vector.extract_strided_slice %118 {offsets = [0, 32], sizes = [2, 32], strides = [1, 1]} : vector<2x96xf32> to vector<2x32xf32>
    %129 = arith.addf %127, %128 : vector<2x32xf32>
    %130 = arith.negf %129 : vector<2x32xf32>
    %131 = math.exp %130 : vector<2x32xf32>
    %cst_34 = arith.constant 1.000000e+00 : f32
    %132 = vector.broadcast %cst_34 : f32 to vector<2x32xf32>
    %133 = arith.addf %132, %131 : vector<2x32xf32>
    %134 = arith.divf %132, %133 : vector<2x32xf32>
    %135 = vector.extract_strided_slice %117 {offsets = [0, 64], sizes = [2, 32], strides = [1, 1]} : vector<2x96xf32> to vector<2x32xf32>
    %136 = vector.extract_strided_slice %118 {offsets = [0, 64], sizes = [2, 32], strides = [1, 1]} : vector<2x96xf32> to vector<2x32xf32>
    %137 = vector.broadcast %1 : vector<1x32xf32> to vector<2x32xf32>
    %138 = arith.addf %136, %137 : vector<2x32xf32>
    %139 = arith.mulf %126, %138 : vector<2x32xf32>
    %140 = arith.addf %135, %139 : vector<2x32xf32>
    %141 = math.tanh %140 : vector<2x32xf32>
    %cst_35 = arith.constant 1.000000e+00 : f32
    %142 = vector.broadcast %cst_35 : f32 to vector<2x32xf32>
    %143 = arith.subf %142, %134 : vector<2x32xf32>
    %144 = arith.mulf %143, %141 : vector<2x32xf32>
    %145 = arith.mulf %134, %109 : vector<2x32xf32>
    %146 = arith.addf %144, %145 : vector<2x32xf32>
    %147 = arith.index_cast %114 : i32 to index
    %c0_36 = arith.constant 0 : index
    %c0_37 = arith.constant 0 : index
    %148 = vector.load %arg3[%147, %c0_36, %c0_37] : memref<8x2x32xf32, #tpu.memory_space<vmem>>, vector<1x2x32xf32>
    %149 = vector.shape_cast %148 : vector<1x2x32xf32> to vector<2x32xf32>
    %150 = vector.shape_cast %146 : vector<2x32xf32> to vector<1x2x32xf32>
    tpu.vector_store %arg3[%147, %c0_36, %c0_37], %150 {strides = array<i32>} : memref<8x2x32xf32, #tpu.memory_space<vmem>>, vector<1x2x32xf32>,
    %c4_i32 = arith.constant 4 : i32
    %c7_i32_38 = arith.constant 7 : i32
    %151 = arith.subi %c7_i32_38, %c4_i32 : i32
    %152 = arith.index_cast %151 : i32 to index
    %c0_39 = arith.constant 0 : index
    %c0_40 = arith.constant 0 : index
    %153 = vector.load %arg0[%152, %c0_39, %c0_40] : memref<8x2x96xf32, #tpu.memory_space<vmem>>, vector<1x2x96xf32>
    %154 = vector.shape_cast %153 : vector<1x2x96xf32> to vector<2x96xf32>
    %cst_41 = arith.constant dense<0.000000e+00> : vector<2x96xf32>
    %155 = tpu.matmul %146, %0, %cst_41 {dimension_numbers = #tpu.dot_dimension_numbers<[1], [0], [0], [1], [0, 0, 1, 1], [], []>} : vector<2x32xf32>, vector<32x96xf32>, vector<2x96xf32> -> vector<2x96xf32>
    %156 = vector.extract_strided_slice %154 {offsets = [0, 0], sizes = [2, 32], strides = [1, 1]} : vector<2x96xf32> to vector<2x32xf32>
    %157 = vector.extract_strided_slice %155 {offsets = [0, 0], sizes = [2, 32], strides = [1, 1]} : vector<2x96xf32> to vector<2x32xf32>
    %158 = arith.addf %156, %157 : vector<2x32xf32>
    %159 = arith.negf %158 : vector<2x32xf32>
    %160 = math.exp %159 : vector<2x32xf32>
    %cst_42 = arith.constant 1.000000e+00 : f32
    %161 = vector.broadcast %cst_42 : f32 to vector<2x32xf32>
    %162 = arith.addf %161, %160 : vector<2x32xf32>
    %163 = arith.divf %161, %162 : vector<2x32xf32>
    %164 = vector.extract_strided_slice %154 {offsets = [0, 32], sizes = [2, 32], strides = [1, 1]} : vector<2x96xf32> to vector<2x32xf32>
    %165 = vector.extract_strided_slice %155 {offsets = [0, 32], sizes = [2, 32], strides = [1, 1]} : vector<2x96xf32> to vector<2x32xf32>
    %166 = arith.addf %164, %165 : vector<2x32xf32>
    %167 = arith.negf %166 : vector<2x32xf32>
    %168 = math.exp %167 : vector<2x32xf32>
    %cst_43 = arith.constant 1.000000e+00 : f32
    %169 = vector.broadcast %cst_43 : f32 to vector<2x32xf32>
    %170 = arith.addf %169, %168 : vector<2x32xf32>
    %171 = arith.divf %169, %170 : vector<2x32xf32>
    %172 = vector.extract_strided_slice %154 {offsets = [0, 64], sizes = [2, 32], strides = [1, 1]} : vector<2x96xf32> to vector<2x32xf32>
    %173 = vector.extract_strided_slice %155 {offsets = [0, 64], sizes = [2, 32], strides = [1, 1]} : vector<2x96xf32> to vector<2x32xf32>
    %174 = vector.broadcast %1 : vector<1x32xf32> to vector<2x32xf32>
    %175 = arith.addf %173, %174 : vector<2x32xf32>
    %176 = arith.mulf %163, %175 : vector<2x32xf32>
    %177 = arith.addf %172, %176 : vector<2x32xf32>
    %178 = math.tanh %177 : vector<2x32xf32>
    %cst_44 = arith.constant 1.000000e+00 : f32
    %179 = vector.broadcast %cst_44 : f32 to vector<2x32xf32>
    %180 = arith.subf %179, %171 : vector<2x32xf32>
    %181 = arith.mulf %180, %178 : vector<2x32xf32>
    %182 = arith.mulf %171, %146 : vector<2x32xf32>
    %183 = arith.addf %181, %182 : vector<2x32xf32>
    %184 = arith.index_cast %151 : i32 to index
    %c0_45 = arith.constant 0 : index
    %c0_46 = arith.constant 0 : index
    %185 = vector.load %arg3[%184, %c0_45, %c0_46] : memref<8x2x32xf32, #tpu.memory_space<vmem>>, vector<1x2x32xf32>
    %186 = vector.shape_cast %185 : vector<1x2x32xf32> to vector<2x32xf32>
    %187 = vector.shape_cast %183 : vector<2x32xf32> to vector<1x2x32xf32>
    tpu.vector_store %arg3[%184, %c0_45, %c0_46], %187 {strides = array<i32>} : memref<8x2x32xf32, #tpu.memory_space<vmem>>, vector<1x2x32xf32>,
    %c5_i32 = arith.constant 5 : i32
    %c7_i32_47 = arith.constant 7 : i32
    %188 = arith.subi %c7_i32_47, %c5_i32 : i32
    %189 = arith.index_cast %188 : i32 to index
    %c0_48 = arith.constant 0 : index
    %c0_49 = arith.constant 0 : index
    %190 = vector.load %arg0[%189, %c0_48, %c0_49] : memref<8x2x96xf32, #tpu.memory_space<vmem>>, vector<1x2x96xf32>
    %191 = vector.shape_cast %190 : vector<1x2x96xf32> to vector<2x96xf32>
    %cst_50 = arith.constant dense<0.000000e+00> : vector<2x96xf32>
    %192 = tpu.matmul %183, %0, %cst_50 {dimension_numbers = #tpu.dot_dimension_numbers<[1], [0], [0], [1], [0, 0, 1, 1], [], []>} : vector<2x32xf32>, vector<32x96xf32>, vector<2x96xf32> -> vector<2x96xf32>
    %193 = vector.extract_strided_slice %191 {offsets = [0, 0], sizes = [2, 32], strides = [1, 1]} : vector<2x96xf32> to vector<2x32xf32>
    %194 = vector.extract_strided_slice %192 {offsets = [0, 0], sizes = [2, 32], strides = [1, 1]} : vector<2x96xf32> to vector<2x32xf32>
    %195 = arith.addf %193, %194 : vector<2x32xf32>
    %196 = arith.negf %195 : vector<2x32xf32>
    %197 = math.exp %196 : vector<2x32xf32>
    %cst_51 = arith.constant 1.000000e+00 : f32
    %198 = vector.broadcast %cst_51 : f32 to vector<2x32xf32>
    %199 = arith.addf %198, %197 : vector<2x32xf32>
    %200 = arith.divf %198, %199 : vector<2x32xf32>
    %201 = vector.extract_strided_slice %191 {offsets = [0, 32], sizes = [2, 32], strides = [1, 1]} : vector<2x96xf32> to vector<2x32xf32>
    %202 = vector.extract_strided_slice %192 {offsets = [0, 32], sizes = [2, 32], strides = [1, 1]} : vector<2x96xf32> to vector<2x32xf32>
    %203 = arith.addf %201, %202 : vector<2x32xf32>
    %204 = arith.negf %203 : vector<2x32xf32>
    %205 = math.exp %204 : vector<2x32xf32>
    %cst_52 = arith.constant 1.000000e+00 : f32
    %206 = vector.broadcast %cst_52 : f32 to vector<2x32xf32>
    %207 = arith.addf %206, %205 : vector<2x32xf32>
    %208 = arith.divf %206, %207 : vector<2x32xf32>
    %209 = vector.extract_strided_slice %191 {offsets = [0, 64], sizes = [2, 32], strides = [1, 1]} : vector<2x96xf32> to vector<2x32xf32>
    %210 = vector.extract_strided_slice %192 {offsets = [0, 64], sizes = [2, 32], strides = [1, 1]} : vector<2x96xf32> to vector<2x32xf32>
    %211 = vector.broadcast %1 : vector<1x32xf32> to vector<2x32xf32>
    %212 = arith.addf %210, %211 : vector<2x32xf32>
    %213 = arith.mulf %200, %212 : vector<2x32xf32>
    %214 = arith.addf %209, %213 : vector<2x32xf32>
    %215 = math.tanh %214 : vector<2x32xf32>
    %cst_53 = arith.constant 1.000000e+00 : f32
    %216 = vector.broadcast %cst_53 : f32 to vector<2x32xf32>
    %217 = arith.subf %216, %208 : vector<2x32xf32>
    %218 = arith.mulf %217, %215 : vector<2x32xf32>
    %219 = arith.mulf %208, %183 : vector<2x32xf32>
    %220 = arith.addf %218, %219 : vector<2x32xf32>
    %221 = arith.index_cast %188 : i32 to index
    %c0_54 = arith.constant 0 : index
    %c0_55 = arith.constant 0 : index
    %222 = vector.load %arg3[%221, %c0_54, %c0_55] : memref<8x2x32xf32, #tpu.memory_space<vmem>>, vector<1x2x32xf32>
    %223 = vector.shape_cast %222 : vector<1x2x32xf32> to vector<2x32xf32>
    %224 = vector.shape_cast %220 : vector<2x32xf32> to vector<1x2x32xf32>
    tpu.vector_store %arg3[%221, %c0_54, %c0_55], %224 {strides = array<i32>} : memref<8x2x32xf32, #tpu.memory_space<vmem>>, vector<1x2x32xf32>,
    %c6_i32 = arith.constant 6 : i32
    %c7_i32_56 = arith.constant 7 : i32
    %225 = arith.subi %c7_i32_56, %c6_i32 : i32
    %226 = arith.index_cast %225 : i32 to index
    %c0_57 = arith.constant 0 : index
    %c0_58 = arith.constant 0 : index
    %227 = vector.load %arg0[%226, %c0_57, %c0_58] : memref<8x2x96xf32, #tpu.memory_space<vmem>>, vector<1x2x96xf32>
    %228 = vector.shape_cast %227 : vector<1x2x96xf32> to vector<2x96xf32>
    %cst_59 = arith.constant dense<0.000000e+00> : vector<2x96xf32>
    %229 = tpu.matmul %220, %0, %cst_59 {dimension_numbers = #tpu.dot_dimension_numbers<[1], [0], [0], [1], [0, 0, 1, 1], [], []>} : vector<2x32xf32>, vector<32x96xf32>, vector<2x96xf32> -> vector<2x96xf32>
    %230 = vector.extract_strided_slice %228 {offsets = [0, 0], sizes = [2, 32], strides = [1, 1]} : vector<2x96xf32> to vector<2x32xf32>
    %231 = vector.extract_strided_slice %229 {offsets = [0, 0], sizes = [2, 32], strides = [1, 1]} : vector<2x96xf32> to vector<2x32xf32>
    %232 = arith.addf %230, %231 : vector<2x32xf32>
    %233 = arith.negf %232 : vector<2x32xf32>
    %234 = math.exp %233 : vector<2x32xf32>
    %cst_60 = arith.constant 1.000000e+00 : f32
    %235 = vector.broadcast %cst_60 : f32 to vector<2x32xf32>
    %236 = arith.addf %235, %234 : vector<2x32xf32>
    %237 = arith.divf %235, %236 : vector<2x32xf32>
    %238 = vector.extract_strided_slice %228 {offsets = [0, 32], sizes = [2, 32], strides = [1, 1]} : vector<2x96xf32> to vector<2x32xf32>
    %239 = vector.extract_strided_slice %229 {offsets = [0, 32], sizes = [2, 32], strides = [1, 1]} : vector<2x96xf32> to vector<2x32xf32>
    %240 = arith.addf %238, %239 : vector<2x32xf32>
    %241 = arith.negf %240 : vector<2x32xf32>
    %242 = math.exp %241 : vector<2x32xf32>
    %cst_61 = arith.constant 1.000000e+00 : f32
    %243 = vector.broadcast %cst_61 : f32 to vector<2x32xf32>
    %244 = arith.addf %243, %242 : vector<2x32xf32>
    %245 = arith.divf %243, %244 : vector<2x32xf32>
    %246 = vector.extract_strided_slice %228 {offsets = [0, 64], sizes = [2, 32], strides = [1, 1]} : vector<2x96xf32> to vector<2x32xf32>
    %247 = vector.extract_strided_slice %229 {offsets = [0, 64], sizes = [2, 32], strides = [1, 1]} : vector<2x96xf32> to vector<2x32xf32>
    %248 = vector.broadcast %1 : vector<1x32xf32> to vector<2x32xf32>
    %249 = arith.addf %247, %248 : vector<2x32xf32>
    %250 = arith.mulf %237, %249 : vector<2x32xf32>
    %251 = arith.addf %246, %250 : vector<2x32xf32>
    %252 = math.tanh %251 : vector<2x32xf32>
    %cst_62 = arith.constant 1.000000e+00 : f32
    %253 = vector.broadcast %cst_62 : f32 to vector<2x32xf32>
    %254 = arith.subf %253, %245 : vector<2x32xf32>
    %255 = arith.mulf %254, %252 : vector<2x32xf32>
    %256 = arith.mulf %245, %220 : vector<2x32xf32>
    %257 = arith.addf %255, %256 : vector<2x32xf32>
    %258 = arith.index_cast %225 : i32 to index
    %c0_63 = arith.constant 0 : index
    %c0_64 = arith.constant 0 : index
    %259 = vector.load %arg3[%258, %c0_63, %c0_64] : memref<8x2x32xf32, #tpu.memory_space<vmem>>, vector<1x2x32xf32>
    %260 = vector.shape_cast %259 : vector<1x2x32xf32> to vector<2x32xf32>
    %261 = vector.shape_cast %257 : vector<2x32xf32> to vector<1x2x32xf32>
    tpu.vector_store %arg3[%258, %c0_63, %c0_64], %261 {strides = array<i32>} : memref<8x2x32xf32, #tpu.memory_space<vmem>>, vector<1x2x32xf32>,
    %c7_i32_65 = arith.constant 7 : i32
    %c7_i32_66 = arith.constant 7 : i32
    %262 = arith.subi %c7_i32_66, %c7_i32_65 : i32
    %263 = arith.index_cast %262 : i32 to index
    %c0_67 = arith.constant 0 : index
    %c0_68 = arith.constant 0 : index
    %264 = vector.load %arg0[%263, %c0_67, %c0_68] : memref<8x2x96xf32, #tpu.memory_space<vmem>>, vector<1x2x96xf32>
    %265 = vector.shape_cast %264 : vector<1x2x96xf32> to vector<2x96xf32>
    %cst_69 = arith.constant dense<0.000000e+00> : vector<2x96xf32>
    %266 = tpu.matmul %257, %0, %cst_69 {dimension_numbers = #tpu.dot_dimension_numbers<[1], [0], [0], [1], [0, 0, 1, 1], [], []>} : vector<2x32xf32>, vector<32x96xf32>, vector<2x96xf32> -> vector<2x96xf32>
    %267 = vector.extract_strided_slice %265 {offsets = [0, 0], sizes = [2, 32], strides = [1, 1]} : vector<2x96xf32> to vector<2x32xf32>
    %268 = vector.extract_strided_slice %266 {offsets = [0, 0], sizes = [2, 32], strides = [1, 1]} : vector<2x96xf32> to vector<2x32xf32>
    %269 = arith.addf %267, %268 : vector<2x32xf32>
    %270 = arith.negf %269 : vector<2x32xf32>
    %271 = math.exp %270 : vector<2x32xf32>
    %cst_70 = arith.constant 1.000000e+00 : f32
    %272 = vector.broadcast %cst_70 : f32 to vector<2x32xf32>
    %273 = arith.addf %272, %271 : vector<2x32xf32>
    %274 = arith.divf %272, %273 : vector<2x32xf32>
    %275 = vector.extract_strided_slice %265 {offsets = [0, 32], sizes = [2, 32], strides = [1, 1]} : vector<2x96xf32> to vector<2x32xf32>
    %276 = vector.extract_strided_slice %266 {offsets = [0, 32], sizes = [2, 32], strides = [1, 1]} : vector<2x96xf32> to vector<2x32xf32>
    %277 = arith.addf %275, %276 : vector<2x32xf32>
    %278 = arith.negf %277 : vector<2x32xf32>
    %279 = math.exp %278 : vector<2x32xf32>
    %cst_71 = arith.constant 1.000000e+00 : f32
    %280 = vector.broadcast %cst_71 : f32 to vector<2x32xf32>
    %281 = arith.addf %280, %279 : vector<2x32xf32>
    %282 = arith.divf %280, %281 : vector<2x32xf32>
    %283 = vector.extract_strided_slice %265 {offsets = [0, 64], sizes = [2, 32], strides = [1, 1]} : vector<2x96xf32> to vector<2x32xf32>
    %284 = vector.extract_strided_slice %266 {offsets = [0, 64], sizes = [2, 32], strides = [1, 1]} : vector<2x96xf32> to vector<2x32xf32>
    %285 = vector.broadcast %1 : vector<1x32xf32> to vector<2x32xf32>
    %286 = arith.addf %284, %285 : vector<2x32xf32>
    %287 = arith.mulf %274, %286 : vector<2x32xf32>
    %288 = arith.addf %283, %287 : vector<2x32xf32>
    %289 = math.tanh %288 : vector<2x32xf32>
    %cst_72 = arith.constant 1.000000e+00 : f32
    %290 = vector.broadcast %cst_72 : f32 to vector<2x32xf32>
    %291 = arith.subf %290, %282 : vector<2x32xf32>
    %292 = arith.mulf %291, %289 : vector<2x32xf32>
    %293 = arith.mulf %282, %257 : vector<2x32xf32>
    %294 = arith.addf %292, %293 : vector<2x32xf32>
    %295 = arith.index_cast %262 : i32 to index
    %c0_73 = arith.constant 0 : index
    %c0_74 = arith.constant 0 : index
    %296 = vector.load %arg3[%295, %c0_73, %c0_74] : memref<8x2x32xf32, #tpu.memory_space<vmem>>, vector<1x2x32xf32>
    %297 = vector.shape_cast %296 : vector<1x2x32xf32> to vector<2x32xf32>
    %298 = vector.shape_cast %294 : vector<2x32xf32> to vector<1x2x32xf32>
    tpu.vector_store %arg3[%295, %c0_73, %c0_74], %298 {strides = array<i32>} : memref<8x2x32xf32, #tpu.memory_space<vmem>>, vector<1x2x32xf32>,
    %c8_i32 = arith.constant 8 : i32
    return
  }
}

</mosaic_0001>

<bundles_post_ra>
// kernel: tpu_custom_call.1
= control target key start
LH: loop header
LB: loop body
LE: loop exit
PB: predicated region body
PF: predicated region fallthrough
CT: control target
= control target key end

     0   :  { %8 = vsyncpa [#allocation3], 0  ;;  %s1396_s0 = inlined_call_operand.hbm [shape: f32[8,2,96], index: 0, kind: input, shape index: {}]   ;;  %s1397_s1 = inlined_call_operand.hbm [shape: f32[32,96], index: 1, kind: input, shape index: {}]   ;;  %s1398_s2 = inlined_call_operand.vmem [shape: f32[1,32], index: 2, kind: input, shape index: {}]   ;;  %s1399_s3 = inlined_call_operand.hbm [shape: f32[8,2,32], index: 3, kind: output, shape index: {}]  }
   0x1   :  { %9 = vsyncpa [#allocation6], 0 }
   0x2   :  { %10 = vsyncpa [#allocation4], 0  ;;  %s1200_s12 = smov [#allocation2]  }
   0x3   :  { %s16_s13 = sshll.u32 %s1200_s12, 4  ;;  %s17_s13 = int_to_ptr.vmem [resolvable:$true] %s16_s13 }
   0x4   :  { %s1142_s14 = scalar_lea.vmem %s17_s13, 256  ;;  %p1147_p1 = scmp.lt.s32.totalorder %s17_s13, %s17_s13 }
   0x5   :  { %p1143_p0 = scmp.ne.s32.totalorder %s17_s13, %s1142_s14  ;;  %p1148_p2 = scmp.lt.s32.totalorder %s1142_s14, %s1142_s14 }
   0x7   :  { %p1149_p3 = por %p1148_p2, %p1147_p1 }
   0x9   :  { %p1150_p4 = pnand %p1149_p3, %p1143_p0 }
   0xb   :  { %1153 = shalt.err (!%p1150_p4)
}
   0xc   :  { %s1201_s15 = smov 32   ;;  %s1202_s16 = smov 2  }
   0xd   :  { %22 = dma.hbm_to_vmem [thread:$0]  %s1396_s0, 256, %s17_s13, [#allocation3], %s1201_s15, %s1201_s15, %s1202_s16  }
   0xe   :  { %s1203_s19 = smov [#allocation5]  }
   0xf   :  { %s28_s20 = sshll.u32 %s1203_s19, 4  ;;  %s29_s20 = int_to_ptr.vmem [resolvable:$true] %s28_s20 }
  0x10   :  { %s1162_s21 = scalar_lea.vmem %s29_s20, 512  ;;  %p1167_p6 = scmp.lt.s32.totalorder %s29_s20, %s29_s20 }
  0x11   :  { %p1163_p5 = scmp.ne.s32.totalorder %s29_s20, %s1162_s21  ;;  %p1168_p7 = scmp.lt.s32.totalorder %s1162_s21, %s1162_s21 }
  0x13   :  { %p1169_p8 = por %p1168_p7, %p1167_p6 }
  0x15   :  { %p1170_p9 = pnand %p1169_p8, %p1163_p5 }
  0x17   :  { %1173 = shalt.err (!%p1170_p9)
}
  0x18   :  { %s1204_s22 = smov 128   ;;  %s1205_s23 = smov 8  }
  0x19   :  { %34 = dma.hbm_to_vmem [thread:$0]  %s1397_s1, 512, %s29_s20, [#allocation6], %s1204_s22, %s1204_s22, %s1205_s23  }
  0x1a   :  { %1194 = dma.done.wait [#allocation3], 256  }
  0x1b   :  { %1195 = vsyncadd [#allocation3], 4294967040 }
  0x1c   :  { %1196 = dma.done.wait [#allocation6], 512  }
  0x1d   :  { %1197 = vsyncadd [#allocation6], 4294966784  ;;  %v1206_v0 = vmov 0.0   ;;  %vm1207_vm0 = vmmov 0   ;;  %v1246_v1 = vld [vmem:[#allocation5 + $0x18] sm:$0xff]  ;;  %v1248_v2 = vld [vmem:[#allocation5 + $0x10] sm:$0xff] }
  0x1e   :  { %987 = vmatprep.subr.mxu0 %v1206_v0  ;;  %995 = vmatprep.mubr.msk.f32.mxu0 %vm1207_vm0, %v1206_v0  ;;  %v932_v3 = vld [vmem:[%s1398_s2] ss:$0 sm:$0xff]  ;;  %v1256_v4 = vld [vmem:[#allocation5 + $0x8] sm:$0xff]  ;;  %s1208_s26 = smov 64   ;;  %v1262_v5 = vld [vmem:[#allocation5] sm:$0xff]  ;;  %s1209_s2 = smov 96  }
  0x1f   :  { %998 = vmatprep.subr.mxu1 %v1206_v0  ;;  %1006 = vmatprep.mubr.msk.f32.mxu1 %vm1207_vm0, %v1206_v0  ;;  %v49_v10 = vld [vmem:[#allocation2 + $0xe] sm:$0x3]  ;;  %vm164_vm1 = vcmask 254976   ;;  %vm50_vm2 = vcmask 261120   ;;  %v167_v30 = vld [vmem:[#allocation2 + $0xc] sm:$0x3] }
  0x20   :  { %988 = vmatpush3.msra.mxu0 %v1246_v1  ;;  %999 = vmatpush3.msra.mxu1 %v1246_v1  ;;  %v274_v50 = vld [vmem:[#allocation2 + $0xa] sm:$0x3]  ;;  %s1210_s27 = smov [#allocation7]  }
  0x21   :  { %989 = vmatprep.subr.mxu0 %v1206_v0  ;;  %136 = vrot.lane.b32.xlu0 %v932_v3, %s1208_s26  ;;  %s918_s28 = sshll.u32 %s1210_s27, 4  ;;  %s919_s28 = int_to_ptr.vmem [resolvable:$true] %s918_s28 }
  0x22   :  { %990 = vmatpush3.msra.mxu0 %v1248_v2  ;;  %1000 = vmatprep.subr.mxu1 %v1206_v0  ;;  %s1174_s29 = scalar_lea.vmem %s919_s28, 256  ;;  %p1179_p11 = scmp.lt.s32.totalorder %s919_s28, %s919_s28 }
  0x23   :  { %991 = vmatprep.subr.mxu0 %v1206_v0  ;;  %1001 = vmatpush3.msra.mxu1 %v1248_v2  ;;  %p1175_p10 = scmp.ne.s32.totalorder %s919_s28, %s1174_s29  ;;  %p1180_p12 = scmp.lt.s32.totalorder %s1174_s29, %s1174_s29 }
  0x24   :  { %992 = vmatpush3.msra.mxu0 %v1256_v4  ;;  %1002 = vmatprep.subr.mxu1 %v1206_v0 }
  0x25   :  { %993 = vmatprep.subr.mxu0 %v1206_v0  ;;  %1003 = vmatpush3.msra.mxu1 %v1256_v4  ;;  %p1181_p13 = por %p1180_p12, %p1179_p11 }
  0x26   :  { %994 = vmatpush3.msra.mxu0 %v1262_v5  ;;  %1004 = vmatprep.subr.mxu1 %v1206_v0 }
  0x27   :  { %996 = vmatmul.mubr.f32.vlgmr.msra.gmra.mxu0 %v1206_v0  ;;  %1005 = vmatpush3.msra.mxu1 %v1262_v5  ;;  %p1182_p0 = pnand %p1181_p13, %p1175_p10 }
  0x28   :  { %1009 = vmatprep.subr.mxu0 %v1206_v0  ;;  %1017 = vmatprep.mubr.msk.f32.mxu0 %vm1207_vm0, %v1206_v0 }
  0x29   :  { %1010 = vmatpush3.msra.mxu0 %v1246_v1  ;;  %1020 = vmatprep.subr.mxu1 %v1206_v0 }
  0x2a   :  { %1011 = vmatprep.subr.mxu0 %v1206_v0 }
  0x2b   :  { %1012 = vmatpush3.msra.mxu0 %v1248_v2 }
  0x2c   :  { %1013 = vmatprep.subr.mxu0 %v1206_v0 }
  0x2d   :  { %1014 = vmatpush3.msra.mxu0 %v1256_v4 }
  0x2e   :  { %1015 = vmatprep.subr.mxu0 %v1206_v0 }
  0x2f   :  { %1016 = vmatpush3.msra.mxu0 %v1262_v5 }
  0x30   :  { %1031 = vmatprep.subr.mxu0 %v1206_v0 }
  0x93   :  { %v1285_v6 = vpop.permute.xlu0 %136 }
  0xe7   :  { %v120_v7 = vpop.f32.mrf.mxu0 }
  0xe8   :  { %v139_v8 = vadd.f32 %v1285_v6, %v120_v7  ;;  %v124_v11 = vadd.f32 %v120_v7, %v49_v10 }
  0xe9   :  { %v997_v9 = vpop.f32.mrf.mxu0 }
  0xea   :  { %141 = vrot.lane.b32.xlu0 %v139_v8, %s1208_s26  ;;  %v931_v12 = vmul.f32 -1.442695, %v124_v11 }
  0xec   :  { %1086 = vpow2.f32 %v931_v12  ;;  %v381_v12 = vld [vmem:[#allocation2 + $0x8] sm:$0x3] }
  0xf9   :  { %v1087_v13 = vpop.eup %1086 }
  0xfa   :  { %v128_v14 = vadd.f32 1.0, %v1087_v13 }
  0xfc   :  { %1088 = vrcp.f32 %v128_v14 }
 0x109   :  { %v1089_v15 = vpop.eup %1088 }
 0x10a   :  { %v151_v21 = vsub.f32 1.0, %v1089_v15  ;;  %v157_v23 = vmul.f32 0.0, %v1089_v15 }
 0x15c   :  { %v142_v16 = vpop.permute.xlu0 %141 }
 0x15d   :  { %v144_v17 = vmul.f32 %v1089_v15, %v142_v16 }
 0x15f   :  { %146 = vrot.lane.b32.xlu1 %v144_v17, %s1208_s26 }
 0x1d1   :  { %v147_v18 = vpop.permute.xlu1 %146 }
 0x1d2   :  { %v149_v19 = vadd.f32 %v147_v18, %v49_v10 }
 0x1d4   :  { %1090 = vtanh.f32 %v149_v19 }
 0x1e1   :  { %v1091_v20 = vpop.eup %1090 }
 0x1e2   :  { %153 = vrot.lane.b32.xlu1 %v1091_v20, %s1209_s2 }
 0x254   :  { %v154_v22 = vpop.permute.xlu1 %153 }
 0x255   :  { %v156_v24 = vmul.f32 %v154_v22, %v151_v21 }
 0x257   :  { %v158_v25 = vadd.f32 %v157_v23, %v156_v24 }
 0x259   :  { %160 = vrot.lane.b32.xlu0 %v158_v25, %s1209_s2 }
 0x2cb   :  { %v161_v26 = vpop.permute.xlu0 %160 }
 0x2cc   :  { %165 = vst.msk [vmem:[#allocation7 + $0xe] sm:$0x3] %vm164_vm1, %v161_v26  ;;  %1007 = vmatmul.mubr.msk.f32.vlgmr.msra.gmra.mxu1 %vm50_vm2, %v161_v26 }
 0x2cd   :  { %1021 = vmatpush3.msra.mxu1 %v1246_v1  ;;  %1028 = vmatprep.mubr.msk.f32.mxu1 %vm1207_vm0, %v1206_v0 }
 0x2ce   :  { %1022 = vmatprep.subr.mxu1 %v1206_v0 }
 0x2cf   :  { %1023 = vmatpush3.msra.mxu1 %v1248_v2 }
 0x2d0   :  { %1024 = vmatprep.subr.mxu1 %v1206_v0 }
 0x2d1   :  { %1025 = vmatpush3.msra.mxu1 %v1256_v4 }
 0x2d2   :  { %1026 = vmatprep.subr.mxu1 %v1206_v0 }
 0x2d3   :  { %1027 = vmatpush3.msra.mxu1 %v1262_v5 }
 0x2d4   :  { %1042 = vmatprep.subr.mxu1 %v1206_v0 }
 0x38c   :  { %v236_v27 = vpop.f32.mrf.mxu1 }
 0x38d   :  { %v247_v28 = vadd.f32 %v236_v27, %v1285_v6  ;;  %v240_v31 = vadd.f32 %v236_v27, %v167_v30 }
 0x38e   :  { %v1008_v29 = vpop.f32.mrf.mxu1 }
 0x38f   :  { %249 = vrot.lane.b32.xlu1 %v247_v28, %s1208_s26  ;;  %v934_v32 = vmul.f32 -1.442695, %v240_v31 }
 0x391   :  { %1092 = vpow2.f32 %v934_v32  ;;  %v488_v32 = vld [vmem:[#allocation2 + $0x6] sm:$0x3] }
 0x39e   :  { %v1093_v33 = vpop.eup %1092 }
 0x39f   :  { %v244_v34 = vadd.f32 1.0, %v1093_v33 }
 0x3a1   :  { %1094 = vrcp.f32 %v244_v34 }
 0x3ae   :  { %v1095_v35 = vpop.eup %1094 }
 0x3af   :  { %v259_v41 = vsub.f32 1.0, %v1095_v35  ;;  %v265_v43 = vmul.f32 %v1095_v35, %v158_v25 }
 0x401   :  { %v250_v36 = vpop.permute.xlu1 %249 }
 0x402   :  { %v252_v37 = vmul.f32 %v1095_v35, %v250_v36 }
 0x404   :  { %254 = vrot.lane.b32.xlu0 %v252_v37, %s1208_s26 }
 0x476   :  { %v255_v38 = vpop.permute.xlu0 %254 }
 0x477   :  { %v257_v39 = vadd.f32 %v255_v38, %v167_v30 }
 0x479   :  { %1096 = vtanh.f32 %v257_v39 }
 0x486   :  { %v1097_v40 = vpop.eup %1096 }
 0x487   :  { %261 = vrot.lane.b32.xlu1 %v1097_v40, %s1209_s2 }
 0x4f9   :  { %v262_v42 = vpop.permute.xlu1 %261 }
 0x4fa   :  { %v264_v44 = vmul.f32 %v262_v42, %v259_v41 }
 0x4fc   :  { %v266_v45 = vadd.f32 %v265_v43, %v264_v44 }
 0x4fe   :  { %268 = vrot.lane.b32.xlu0 %v266_v45, %s1209_s2 }
 0x570   :  { %v269_v46 = vpop.permute.xlu0 %268 }
 0x571   :  { %272 = vst.msk [vmem:[#allocation7 + $0xc] sm:$0x3] %vm164_vm1, %v269_v46  ;;  %1018 = vmatmul.mubr.msk.f32.vlgmr.msra.gmra.mxu0 %vm50_vm2, %v269_v46 }
 0x572   :  { %1032 = vmatpush3.msra.mxu0 %v1246_v1  ;;  %1039 = vmatprep.mubr.msk.f32.mxu0 %vm1207_vm0, %v1206_v0 }
 0x573   :  { %1033 = vmatprep.subr.mxu0 %v1206_v0 }
 0x574   :  { %1034 = vmatpush3.msra.mxu0 %v1248_v2 }
 0x575   :  { %1035 = vmatprep.subr.mxu0 %v1206_v0 }
 0x576   :  { %1036 = vmatpush3.msra.mxu0 %v1256_v4 }
 0x577   :  { %1037 = vmatprep.subr.mxu0 %v1206_v0 }
 0x578   :  { %1038 = vmatpush3.msra.mxu0 %v1262_v5 }
 0x579   :  { %1053 = vmatprep.subr.mxu0 %v1206_v0 }
 0x631   :  { %v343_v47 = vpop.f32.mrf.mxu0 }
 0x632   :  { %v354_v48 = vadd.f32 %v343_v47, %v1285_v6  ;;  %v347_v51 = vadd.f32 %v343_v47, %v274_v50 }
 0x633   :  { %v1019_v49 = vpop.f32.mrf.mxu0 }
 0x634   :  { %356 = vrot.lane.b32.xlu1 %v354_v48, %s1208_s26  ;;  %v936_v52 = vmul.f32 -1.442695, %v347_v51 }
 0x636   :  { %1098 = vpow2.f32 %v936_v52 }
 0x643   :  { %v1099_v53 = vpop.eup %1098 }
 0x644   :  { %v351_v54 = vadd.f32 1.0, %v1099_v53 }
 0x646   :  { %1100 = vrcp.f32 %v351_v54 }
 0x653   :  { %v1101_v55 = vpop.eup %1100 }
 0x654   :  { %v366_v61 = vsub.f32 1.0, %v1101_v55  ;;  %v372_v63 = vmul.f32 %v1101_v55, %v266_v45 }
 0x6a6   :  { %v357_v56 = vpop.permute.xlu1 %356 }
 0x6a7   :  { %v359_v57 = vmul.f32 %v1101_v55, %v357_v56 }
 0x6a9   :  { %361 = vrot.lane.b32.xlu0 %v359_v57, %s1208_s26 }
 0x71b   :  { %v362_v58 = vpop.permute.xlu0 %361 }
 0x71c   :  { %v364_v59 = vadd.f32 %v362_v58, %v274_v50 }
 0x71e   :  { %1102 = vtanh.f32 %v364_v59 }
 0x72b   :  { %v1103_v60 = vpop.eup %1102 }
 0x72c   :  { %368 = vrot.lane.b32.xlu1 %v1103_v60, %s1209_s2 }
 0x79e   :  { %v369_v62 = vpop.permute.xlu1 %368 }
 0x79f   :  { %v371_v3 = vmul.f32 %v369_v62, %v366_v61 }
 0x7a1   :  { %v373_v7 = vadd.f32 %v372_v63, %v371_v3 }
 0x7a3   :  { %375 = vrot.lane.b32.xlu0 %v373_v7, %s1209_s2 }
 0x815   :  { %v376_v8 = vpop.permute.xlu0 %375 }
 0x816   :  { %379 = vst.msk [vmem:[#allocation7 + $0xa] sm:$0x3] %vm164_vm1, %v376_v8  ;;  %1029 = vmatmul.mubr.msk.f32.vlgmr.msra.gmra.mxu1 %vm50_vm2, %v376_v8 }
 0x817   :  { %1043 = vmatpush3.msra.mxu1 %v1246_v1  ;;  %1050 = vmatprep.mubr.msk.f32.mxu1 %vm1207_vm0, %v1206_v0 }
 0x818   :  { %1044 = vmatprep.subr.mxu1 %v1206_v0 }
 0x819   :  { %1045 = vmatpush3.msra.mxu1 %v1248_v2 }
 0x81a   :  { %1046 = vmatprep.subr.mxu1 %v1206_v0 }
 0x81b   :  { %1047 = vmatpush3.msra.mxu1 %v1256_v4 }
 0x81c   :  { %1048 = vmatprep.subr.mxu1 %v1206_v0 }
 0x81d   :  { %1049 = vmatpush3.msra.mxu1 %v1262_v5 }
 0x81e   :  { %1064 = vmatprep.subr.mxu1 %v1206_v0 }
 0x8d6   :  { %v450_v9 = vpop.f32.mrf.mxu1 }
 0x8d7   :  { %v461_v10 = vadd.f32 %v450_v9, %v1285_v6  ;;  %v454_v13 = vadd.f32 %v450_v9, %v381_v12  ;;  %v702_v9 = vld [vmem:[#allocation2 + $0x2] sm:$0x3] }
 0x8d8   :  { %v1030_v11 = vpop.f32.mrf.mxu1 }
 0x8d9   :  { %463 = vrot.lane.b32.xlu1 %v461_v10, %s1208_s26  ;;  %v938_v14 = vmul.f32 -1.442695, %v454_v13 }
 0x8db   :  { %1104 = vpow2.f32 %v938_v14 }
 0x8e8   :  { %v1105_v15 = vpop.eup %1104 }
 0x8e9   :  { %v458_v16 = vadd.f32 1.0, %v1105_v15 }
 0x8eb   :  { %1106 = vrcp.f32 %v458_v16 }
 0x8f8   :  { %v1107_v17 = vpop.eup %1106 }
 0x8f9   :  { %v473_v23 = vsub.f32 1.0, %v1107_v17  ;;  %v479_v25 = vmul.f32 %v1107_v17, %v373_v7 }
 0x94b   :  { %v464_v18 = vpop.permute.xlu1 %463 }
 0x94c   :  { %v466_v19 = vmul.f32 %v1107_v17, %v464_v18 }
 0x94e   :  { %468 = vrot.lane.b32.xlu0 %v466_v19, %s1208_s26 }
 0x9c0   :  { %v469_v20 = vpop.permute.xlu0 %468 }
 0x9c1   :  { %v471_v21 = vadd.f32 %v469_v20, %v381_v12 }
 0x9c3   :  { %1108 = vtanh.f32 %v471_v21 }
 0x9d0   :  { %v1109_v22 = vpop.eup %1108 }
 0x9d1   :  { %475 = vrot.lane.b32.xlu1 %v1109_v22, %s1209_s2 }
 0xa43   :  { %v476_v24 = vpop.permute.xlu1 %475 }
 0xa44   :  { %v478_v26 = vmul.f32 %v476_v24, %v473_v23 }
 0xa46   :  { %v480_v27 = vadd.f32 %v479_v25, %v478_v26 }
 0xa48   :  { %482 = vrot.lane.b32.xlu0 %v480_v27, %s1209_s2 }
 0xaba   :  { %v483_v28 = vpop.permute.xlu0 %482 }
 0xabb   :  { %486 = vst.msk [vmem:[#allocation7 + $0x8] sm:$0x3] %vm164_vm1, %v483_v28  ;;  %1040 = vmatmul.mubr.msk.f32.vlgmr.msra.gmra.mxu0 %vm50_vm2, %v483_v28 }
 0xabc   :  { %1054 = vmatpush3.msra.mxu0 %v1246_v1  ;;  %1061 = vmatprep.mubr.msk.f32.mxu0 %vm1207_vm0, %v1206_v0 }
 0xabd   :  { %1055 = vmatprep.subr.mxu0 %v1206_v0 }
 0xabe   :  { %1056 = vmatpush3.msra.mxu0 %v1248_v2 }
 0xabf   :  { %1057 = vmatprep.subr.mxu0 %v1206_v0 }
 0xac0   :  { %1058 = vmatpush3.msra.mxu0 %v1256_v4 }
 0xac1   :  { %1059 = vmatprep.subr.mxu0 %v1206_v0 }
 0xac2   :  { %1060 = vmatpush3.msra.mxu0 %v1262_v5 }
 0xb7b   :  { %v557_v29 = vpop.f32.mrf.mxu0 }
 0xb7c   :  { %v568_v30 = vadd.f32 %v557_v29, %v1285_v6  ;;  %v561_v33 = vadd.f32 %v557_v29, %v488_v32  ;;  %v808_v29 = vld [vmem:[#allocation2] sm:$0x3] }
 0xb7d   :  { %v1041_v31 = vpop.f32.mrf.mxu0 }
 0xb7e   :  { %570 = vrot.lane.b32.xlu1 %v568_v30, %s1208_s26  ;;  %v940_v34 = vmul.f32 -1.442695, %v561_v33 }
 0xb80   :  { %1110 = vpow2.f32 %v940_v34 }
 0xb8d   :  { %v1111_v35 = vpop.eup %1110 }
 0xb8e   :  { %v565_v36 = vadd.f32 1.0, %v1111_v35 }
 0xb90   :  { %1112 = vrcp.f32 %v565_v36 }
 0xb9d   :  { %v1113_v37 = vpop.eup %1112 }
 0xb9e   :  { %v580_v43 = vsub.f32 1.0, %v1113_v37  ;;  %v586_v45 = vmul.f32 %v1113_v37, %v480_v27 }
 0xbf0   :  { %v571_v38 = vpop.permute.xlu1 %570 }
 0xbf1   :  { %v573_v39 = vmul.f32 %v1113_v37, %v571_v38 }
 0xbf3   :  { %575 = vrot.lane.b32.xlu0 %v573_v39, %s1208_s26 }
 0xc65   :  { %v576_v40 = vpop.permute.xlu0 %575 }
 0xc66   :  { %v578_v41 = vadd.f32 %v576_v40, %v488_v32 }
 0xc68   :  { %1114 = vtanh.f32 %v578_v41 }
 0xc75   :  { %v1115_v42 = vpop.eup %1114 }
 0xc76   :  { %582 = vrot.lane.b32.xlu1 %v1115_v42, %s1209_s2 }
 0xce8   :  { %v583_v44 = vpop.permute.xlu1 %582 }
 0xce9   :  { %v585_v46 = vmul.f32 %v583_v44, %v580_v43 }
 0xceb   :  { %v587_v47 = vadd.f32 %v586_v45, %v585_v46 }
 0xced   :  { %589 = vrot.lane.b32.xlu0 %v587_v47, %s1209_s2 }
 0xd5f   :  { %v590_v48 = vpop.permute.xlu0 %589 }
 0xd60   :  { %593 = vst.msk [vmem:[#allocation7 + $0x6] sm:$0x3] %vm164_vm1, %v590_v48  ;;  %1051 = vmatmul.mubr.msk.f32.vlgmr.msra.gmra.mxu1 %vm50_vm2, %v590_v48 }
 0xd61   :  { %1065 = vmatpush3.msra.mxu1 %v1246_v1  ;;  %1072 = vmatprep.mubr.msk.f32.mxu1 %vm1207_vm0, %v1206_v0  ;;  %v595_v1 = vld [vmem:[#allocation2 + $0x4] sm:$0x3] }
 0xd62   :  { %1066 = vmatprep.subr.mxu1 %v1206_v0 }
 0xd63   :  { %1067 = vmatpush3.msra.mxu1 %v1248_v2 }
 0xd64   :  { %1068 = vmatprep.subr.mxu1 %v1206_v0 }
 0xd65   :  { %1069 = vmatpush3.msra.mxu1 %v1256_v4 }
 0xd66   :  { %1070 = vmatprep.subr.mxu1 %v1206_v0 }
 0xd67   :  { %1071 = vmatpush3.msra.mxu1 %v1262_v5 }
 0xe20   :  { %v664_v49 = vpop.f32.mrf.mxu1 }
 0xe21   :  { %v675_v50 = vadd.f32 %v664_v49, %v1285_v6  ;;  %v668_v52 = vadd.f32 %v664_v49, %v595_v1 }
 0xe22   :  { %v1052_v51 = vpop.f32.mrf.mxu1 }
 0xe23   :  { %677 = vrot.lane.b32.xlu1 %v675_v50, %s1208_s26  ;;  %v942_v53 = vmul.f32 -1.442695, %v668_v52 }
 0xe25   :  { %1116 = vpow2.f32 %v942_v53 }
 0xe32   :  { %v1117_v54 = vpop.eup %1116 }
 0xe33   :  { %v672_v2 = vadd.f32 1.0, %v1117_v54 }
 0xe35   :  { %1118 = vrcp.f32 %v672_v2 }
 0xe42   :  { %v1119_v55 = vpop.eup %1118 }
 0xe43   :  { %v687_v58 = vsub.f32 1.0, %v1119_v55  ;;  %v693_v60 = vmul.f32 %v1119_v55, %v587_v47 }
 0xe95   :  { %v678_v56 = vpop.permute.xlu1 %677 }
 0xe96   :  { %v680_v4 = vmul.f32 %v1119_v55, %v678_v56 }
 0xe98   :  { %682 = vrot.lane.b32.xlu0 %v680_v4, %s1208_s26 }
 0xf0a   :  { %v683_v0 = vpop.permute.xlu0 %682 }
 0xf0b   :  { %v685_v5 = vadd.f32 %v683_v0, %v595_v1 }
 0xf0d   :  { %1120 = vtanh.f32 %v685_v5 }
 0xf1a   :  { %v1121_v57 = vpop.eup %1120 }
 0xf1b   :  { %689 = vrot.lane.b32.xlu1 %v1121_v57, %s1209_s2 }
 0xf8d   :  { %v690_v59 = vpop.permute.xlu1 %689 }
 0xf8e   :  { %v692_v61 = vmul.f32 %v690_v59, %v687_v58 }
 0xf90   :  { %v694_v62 = vadd.f32 %v693_v60, %v692_v61 }
 0xf92   :  { %696 = vrot.lane.b32.xlu0 %v694_v62, %s1209_s2 }
0x1004   :  { %v697_v63 = vpop.permute.xlu0 %696 }
0x1005   :  { %700 = vst.msk [vmem:[#allocation7 + $0x4] sm:$0x3] %vm164_vm1, %v697_v63  ;;  %1062 = vmatmul.mubr.msk.f32.vlgmr.msra.gmra.mxu0 %vm50_vm2, %v697_v63 }
0x10c5   :  { %v771_v3 = vpop.f32.mrf.mxu0 }
0x10c6   :  { %v782_v7 = vadd.f32 %v771_v3, %v1285_v6  ;;  %v775_v10 = vadd.f32 %v771_v3, %v702_v9 }
0x10c7   :  { %v1063_v8 = vpop.f32.mrf.mxu0 }
0x10c8   :  { %784 = vrot.lane.b32.xlu1 %v782_v7, %s1208_s26  ;;  %v944_v11 = vmul.f32 -1.442695, %v775_v10 }
0x10ca   :  { %1122 = vpow2.f32 %v944_v11 }
0x10d7   :  { %v1123_v12 = vpop.eup %1122 }
0x10d8   :  { %v779_v13 = vadd.f32 1.0, %v1123_v12 }
0x10da   :  { %1124 = vrcp.f32 %v779_v13 }
0x10e7   :  { %v1125_v14 = vpop.eup %1124 }
0x10e8   :  { %v794_v20 = vsub.f32 1.0, %v1125_v14  ;;  %v800_v22 = vmul.f32 %v1125_v14, %v694_v62 }
0x113a   :  { %v785_v15 = vpop.permute.xlu1 %784 }
0x113b   :  { %v787_v16 = vmul.f32 %v1125_v14, %v785_v15 }
0x113d   :  { %789 = vrot.lane.b32.xlu0 %v787_v16, %s1208_s26 }
0x11af   :  { %v790_v17 = vpop.permute.xlu0 %789 }
0x11b0   :  { %v792_v18 = vadd.f32 %v790_v17, %v702_v9 }
0x11b2   :  { %1126 = vtanh.f32 %v792_v18 }
0x11bf   :  { %v1127_v19 = vpop.eup %1126 }
0x11c0   :  { %796 = vrot.lane.b32.xlu1 %v1127_v19, %s1209_s2 }
0x1232   :  { %v797_v21 = vpop.permute.xlu1 %796 }
0x1233   :  { %v799_v23 = vmul.f32 %v797_v21, %v794_v20 }
0x1235   :  { %v801_v24 = vadd.f32 %v800_v22, %v799_v23 }
0x1237   :  { %803 = vrot.lane.b32.xlu0 %v801_v24, %s1209_s2 }
0x12a9   :  { %v804_v25 = vpop.permute.xlu0 %803 }
0x12aa   :  { %807 = vst.msk [vmem:[#allocation7 + $0x2] sm:$0x3] %vm164_vm1, %v804_v25  ;;  %1073 = vmatmul.mubr.msk.f32.vlgmr.msra.gmra.mxu1 %vm50_vm2, %v804_v25 }
0x136a   :  { %v877_v26 = vpop.f32.mrf.mxu1 }
0x136b   :  { %v888_v27 = vadd.f32 %v877_v26, %v1285_v6  ;;  %v881_v30 = vadd.f32 %v877_v26, %v808_v29 }
0x136c   :  { %v1074_v28 = vpop.f32.mrf.mxu1 }
0x136d   :  { %890 = vrot.lane.b32.xlu1 %v888_v27, %s1208_s26  ;;  %v946_v31 = vmul.f32 -1.442695, %v881_v30 }
0x136f   :  { %1128 = vpow2.f32 %v946_v31 }
0x137c   :  { %v1129_v32 = vpop.eup %1128 }
0x137d   :  { %v885_v33 = vadd.f32 1.0, %v1129_v32 }
0x137f   :  { %1130 = vrcp.f32 %v885_v33 }
0x138c   :  { %v1131_v34 = vpop.eup %1130 }
0x138d   :  { %v900_v6 = vsub.f32 1.0, %v1131_v34  ;;  %v906_v41 = vmul.f32 %v1131_v34, %v801_v24 }
0x13df   :  { %v891_v35 = vpop.permute.xlu1 %890 }
0x13e0   :  { %v893_v36 = vmul.f32 %v1131_v34, %v891_v35 }
0x13e2   :  { %895 = vrot.lane.b32.xlu0 %v893_v36, %s1208_s26 }
0x1454   :  { %v896_v37 = vpop.permute.xlu0 %895 }
0x1455   :  { %v898_v38 = vadd.f32 %v896_v37, %v808_v29 }
0x1457   :  { %1132 = vtanh.f32 %v898_v38 }
0x1464   :  { %v1133_v39 = vpop.eup %1132 }
0x1465   :  { %902 = vrot.lane.b32.xlu1 %v1133_v39, %s1209_s2 }
0x14d7   :  { %v903_v40 = vpop.permute.xlu1 %902 }
0x14d8   :  { %v905_v42 = vmul.f32 %v903_v40, %v900_v6 }
0x14da   :  { %v907_v43 = vadd.f32 %v906_v41, %v905_v42 }
0x14dc   :  { %909 = vrot.lane.b32.xlu0 %v907_v43, %s1209_s2 }
0x154e   :  { %v910_v44 = vpop.permute.xlu0 %909 }
0x154f   :  { %912 = vst.msk [vmem:[#allocation7] sm:$0x3] %vm164_vm1, %v910_v44 }
0x1550   :  { %1185 = shalt.err (!%p1182_p0)
}
0x1551   :  { %924 = dma.vmem_to_hbm [thread:$0]  %s919_s28, 256, %s1399_s3, [#allocation4], %s1201_s15, %s1201_s15, %s1202_s16  }
0x1552   :  { %1198 = dma.done.wait [#allocation4], 256  }
0x1553   :  { %1199 = vsyncadd [#allocation4], 4294967040 }
0x1554   :  { %928 = vsyncpa [#allocation3], 1 }
0x1555   :  { %929 = vsyncpa [#allocation6], 1 }
0x1556   :  { %930 = vsyncpa [#allocation4], 1 }

</bundles_post_ra>
